<compile_context>
chip_gen: v7x
topology: tpu7x:2x2x1
jax: 0.10.0
libtpu: 0.0.40
codegen_flags: <defaults>
</compile_context>

<pallas_src>
import functools

import jax
import jax.numpy as jnp
from jax import lax
from jax.experimental import pallas as pl
from jax.experimental.pallas import tpu as pltpu


def _round_up(x, m):
    return (x + m - 1) // m * m


def wavenet_kernel(x_ref, tloc_ref, win_ref, bin_ref, convw_ref, wout_ref,
                   bout_ref, o_ref, *, block_num, block_layers):
    bblk, t_len, cin = x_ref.shape
    bt = bblk * t_len

    # Input 1x1 conv (with bias): (BT, Cin) @ (Cin, Hp) on the MXU, f32 accum.
    xb = x_ref[...].reshape(bt, cin).astype(jnp.bfloat16)
    h = jnp.dot(xb, win_ref[...], preferred_element_type=jnp.float32)
    h = h + bin_ref[...]                                   # (BT, Hp) f32

    # Local (within-sample) time index as a (BT, 1) column, loaded once.
    t_loc = tloc_ref[...]

    def block_body(b, h):
        res = h
        for i in range(block_layers):            # static dilations, unrolled
            d = 2 ** i
            layer = b * block_layers + i         # dynamic weight index
            # x[t-d] with zero padding: sublane roll over the flattened
            # (Bblk*T) axis; rows with local time < d (including rows that
            # wrapped across batch boundaries) are masked to zero.
            shifted = pltpu.roll(h, shift=d, axis=0)
            shifted = jnp.where(t_loc >= d, shifted, 0.0)
            # Fused two-tap conv: concat along lanes -> one (BT,2Hp)@(2Hp,Hp).
            xk = jnp.concatenate(
                [shifted.astype(jnp.bfloat16), h.astype(jnp.bfloat16)],
                axis=-1)
            h = jnp.dot(xk, convw_ref[layer],
                        preferred_element_type=jnp.float32)
            h = jnp.maximum(h, 0.0)              # ReLU (f32)
        return h + res                           # residual (f32)

    h = lax.fori_loop(0, block_num, block_body, h)

    # Output 1x1 conv (with bias), lane-dense (Coutp multiple of 128) store.
    out = jnp.dot(h.astype(jnp.bfloat16), wout_ref[...],
                  preferred_element_type=jnp.float32)
    out = out + bout_ref[...]
    o_ref[...] = out.reshape(bblk, t_len, o_ref.shape[2]).astype(o_ref.dtype)


def _pick_batch_block(batch, t_len):
    """Largest divisor of batch with Bblk*T <= ~256 rows, keeping grid >= 2."""
    max_blk = max(1, 256 // max(t_len, 1))
    divisors = [c for c in range(1, batch + 1)
                if batch % c == 0 and c <= max_blk]
    if not divisors:
        return 1
    multi_step = [c for c in divisors if batch // c >= 2]
    return max(multi_step) if multi_step else max(divisors)


def wavenet_forward(x, params, *, block_num, block_layers):
    """x: (B, T, input_size) float32 -> (B, T, out_dim) float32."""
    B, T, Cin = x.shape
    win, bin_, convw, wout, bout = params
    H = win.shape[1]
    Cout = wout.shape[1]
    L = block_num * block_layers
    assert convw.shape[0] == L

    Hp = _round_up(H, 128)
    Coutp = _round_up(Cout, 128)

    # Pad to lane-dense shapes (zero padding keeps the math unchanged), fuse
    # the two conv taps into a single (2Hp, Hp) contraction, cast weights to
    # bf16 for the MXU; biases stay f32.
    win_p = (jnp.zeros((Cin, Hp), jnp.float32)
             .at[:, :H].set(win).astype(jnp.bfloat16))
    bin_p = jnp.zeros((1, Hp), jnp.float32).at[:, :H].set(bin_)
    convw_p = (jnp.zeros((L, 2 * Hp, Hp), jnp.float32)
               .at[:, :H, :H].set(convw[:, 0])          # tap 0 -> x[t-d]
               .at[:, Hp:Hp + H, :H].set(convw[:, 1])   # tap 1 -> x[t]
               .astype(jnp.bfloat16))
    wout_p = (jnp.zeros((Hp, Coutp), jnp.float32)
              .at[:H, :Cout].set(wout).astype(jnp.bfloat16))
    bout_p = jnp.zeros((1, Coutp), jnp.float32).at[:, :Cout].set(bout)

    Bblk = _pick_batch_block(B, T)
    BT = Bblk * T
    t_loc = jnp.tile(jnp.arange(T, dtype=jnp.int32), Bblk).reshape(BT, 1)

    # VMEM budget: weights (+double buffer) + double-buffered x/out blocks +
    # activation temporaries; clamp to sane per-generation bounds.
    w_bytes = ((win_p.size + convw_p.size + wout_p.size) * 2
               + (bin_p.size + bout_p.size) * 4)
    io_bytes = 2 * (BT * Cin * 4 + BT * Coutp * 4 + BT * 4)
    act_bytes = BT * Hp * 4 * 4 + BT * 2 * Hp * 2 * 2
    vmem_limit = int(min(100 * 2 ** 20,
                         max(32 * 2 ** 20,
                             2 * w_bytes + io_bytes + act_bytes + (8 << 20))))

    kernel = functools.partial(wavenet_kernel,
                               block_num=block_num,
                               block_layers=block_layers)

    out_p = pl.pallas_call(
        kernel,
        out_shape=jax.ShapeDtypeStruct((B, T, Coutp), jnp.float32),
        grid_spec=pltpu.PrefetchScalarGridSpec(
            num_scalar_prefetch=0,
            grid=(B // Bblk,),
            in_specs=[
                pl.BlockSpec((Bblk, T, Cin), lambda b: (b, 0, 0)),
                pl.BlockSpec((BT, 1), lambda b: (0, 0)),
                pl.BlockSpec((Cin, Hp), lambda b: (0, 0)),
                pl.BlockSpec((1, Hp), lambda b: (0, 0)),
                pl.BlockSpec((L, 2 * Hp, Hp), lambda b: (0, 0, 0)),
                pl.BlockSpec((Hp, Coutp), lambda b: (0, 0)),
                pl.BlockSpec((1, Coutp), lambda b: (0, 0)),
            ],
            out_specs=pl.BlockSpec((Bblk, T, Coutp), lambda b: (b, 0, 0)),
        ),
        compiler_params=pltpu.CompilerParams(
            dimension_semantics=("parallel",),
            vmem_limit_bytes=vmem_limit,
        ),
    )(x, t_loc, win_p, bin_p, convw_p, wout_p, bout_p)

    # TODO(synk): for v7x (64 MiB VMEM) at production L/H, stream convw per
    # layer (pl.ANY + make_async_copy double buffer) or single-buffer the
    # grid-invariant weight inputs; for very long T, tile time with a
    # 2**(block_layers-1) halo instead of holding (T, Hp) resident.

    # Slice off the lane padding on the output channels.
    return out_p[..., :Cout]


def init_params(key, input_size, hidden_dim, out_dim, block_num, block_layers):
    """Deterministic synthetic weights (pre-transposed to (Cin, Cout))."""
    L = block_num * block_layers
    k = jax.random.split(key, 5)
    win = jax.random.normal(k[0], (input_size, hidden_dim), jnp.float32) * 0.2
    bin_ = jax.random.normal(k[1], (1, hidden_dim), jnp.float32) * 0.1
    # Masked conv weights: only taps 0 and 1 (tap 2 is masked out by MaskedCNN).
    convw = jax.random.normal(k[2], (L, 2, hidden_dim, hidden_dim),
                              jnp.float32) * 0.1
    wout = jax.random.normal(k[3], (hidden_dim, out_dim), jnp.float32) * 0.2
    bout = jax.random.normal(k[4], (1, out_dim), jnp.float32) * 0.1
    return win, bin_, convw, wout, bout


def wavenet_reference(x, params, *, block_num, block_layers):
    """Pure-JAX reference with identical math for a correctness check."""
    win, bin_, convw, wout, bout = params
    h = x @ win + bin_                                    # (B, T, H)
    layer = 0
    for _ in range(block_num):
        res = h
        for i in range(block_layers):
            d = 2 ** i
            shifted = jnp.pad(h, ((0, 0), (d, 0), (0, 0)))[:, :-d, :]
            h = shifted @ convw[layer, 0] + h @ convw[layer, 1]
            h = jnp.maximum(h, 0.0)
            layer += 1
        h = h + res
    return h @ wout + bout


if __name__ == "__main__":
    # Small config consistent with WaveNet(block_layers, block_num, input_size,
    # hidden_dim, out_dim, activate_func="ReLU").
    block_layers = 2
    block_num = 2
    input_size = 8
    hidden_dim = 32
    out_dim = 8
    B, T = 2, 16

    key = jax.random.PRNGKey(0)
    kx, kp = jax.random.split(key)
    x = jax.random.normal(kx, (B, T, input_size), jnp.float32)
    params = init_params(kp, input_size, hidden_dim, out_dim,
                         block_num, block_layers)

    out = wavenet_forward(x, params, block_num=block_num,
                          block_layers=block_layers)
    out = jax.block_until_ready(out)
    assert out.shape == (B, T, out_dim)

    # Semantic check vs exact f32 module math (loose: kernel uses bf16 MXU
    # inputs with f32 accumulation).
    ref_f32 = wavenet_reference(x, params, block_num=block_num,
                                block_layers=block_layers)
    assert jnp.allclose(out, ref_f32, atol=1e-1, rtol=1e-1)

    # Tight check vs the same bf16-rounded weights (isolates kernel mechanics:
    # shift/mask/fusion/residual/indexing) -- only activation rounding differs.
    win, bin_, convw, wout, bout = params
    bf = lambda w: w.astype(jnp.bfloat16).astype(jnp.float32)
    ref_bf16 = wavenet_reference(
        x, (bf(win), bin_, bf(convw), bf(wout), bout),
        block_num=block_num, block_layers=block_layers)
    assert jnp.allclose(out, ref_bf16, atol=3e-2, rtol=3e-2)

    print("KERNEL_OK")
</pallas_src>

<mosaic_0001>
module attributes {stable_mosaic.version = 11 : i64} {
  func.func @wavenet_kernel(%arg0: i32, %arg1: memref<1x16x8xf32, #tpu.memory_space<vmem>>, %arg2: memref<16x1xi32, #tpu.memory_space<vmem>>, %arg3: memref<8x128xbf16, #tpu.memory_space<vmem>>, %arg4: memref<1x128xf32, #tpu.memory_space<vmem>>, %arg5: memref<4x256x128xbf16, #tpu.memory_space<vmem>>, %arg6: memref<128x128xbf16, #tpu.memory_space<vmem>>, %arg7: memref<1x128xf32, #tpu.memory_space<vmem>>, %arg8: memref<1x16x128xf32, #tpu.memory_space<vmem>>) attributes {dimension_semantics = [#tpu.dimension_semantics<parallel>], iteration_bounds = array<i64: 2>, scalar_prefetch = 0 : i64, scratch_operands = 0 : i64, tpu.core_type = #tpu.core_type<tc>, window_params = [{transform_indices = @transform_0, window_bounds = array<i64: 1, 16, 8>}, {pipeline_mode = #tpu.pipeline_mode<synchronous>, transform_indices = @transform_1, window_bounds = array<i64: 16, 1>}, {pipeline_mode = #tpu.pipeline_mode<synchronous>, transform_indices = @transform_2, window_bounds = array<i64: 8, 128>}, {pipeline_mode = #tpu.pipeline_mode<synchronous>, transform_indices = @transform_3, window_bounds = array<i64: 1, 128>}, {pipeline_mode = #tpu.pipeline_mode<synchronous>, transform_indices = @transform_4, window_bounds = array<i64: 4, 256, 128>}, {pipeline_mode = #tpu.pipeline_mode<synchronous>, transform_indices = @transform_5, window_bounds = array<i64: 128, 128>}, {pipeline_mode = #tpu.pipeline_mode<synchronous>, transform_indices = @transform_6, window_bounds = array<i64: 1, 128>}, {transform_indices = @transform_7, window_bounds = array<i64: 1, 16, 128>}]} {
    %c0 = arith.constant 0 : index
    %c0_0 = arith.constant 0 : index
    %c0_1 = arith.constant 0 : index
    %0 = vector.load %arg1[%c0, %c0_0, %c0_1] : memref<1x16x8xf32, #tpu.memory_space<vmem>>, vector<1x16x8xf32>
    %1 = vector.shape_cast %0 : vector<1x16x8xf32> to vector<16x8xf32>
    %2 = arith.truncf %1 : vector<16x8xf32> to vector<16x8xbf16>
    %c0_2 = arith.constant 0 : index
    %c0_3 = arith.constant 0 : index
    %3 = vector.load %arg3[%c0_2, %c0_3] : memref<8x128xbf16, #tpu.memory_space<vmem>>, vector<8x128xbf16>
    %cst = arith.constant dense<0.000000e+00> : vector<16x128xf32>
    %4 = tpu.matmul %2, %3, %cst {dimension_numbers = #tpu.dot_dimension_numbers<[1], [0], [0], [1], [0, 0, 1, 1], [], []>} : vector<16x8xbf16>, vector<8x128xbf16>, vector<16x128xf32> -> vector<16x128xf32>
    %c0_4 = arith.constant 0 : index
    %c0_5 = arith.constant 0 : index
    %5 = vector.load %arg4[%c0_4, %c0_5] : memref<1x128xf32, #tpu.memory_space<vmem>>, vector<1x128xf32>
    %6 = vector.broadcast %5 : vector<1x128xf32> to vector<16x128xf32>
    %7 = arith.addf %4, %6 : vector<16x128xf32>
    %c0_6 = arith.constant 0 : index
    %c0_7 = arith.constant 0 : index
    %8 = vector.load %arg2[%c0_6, %c0_7] : memref<16x1xi32, #tpu.memory_space<vmem>>, vector<16x1xi32>
    %c0_i32 = arith.constant 0 : i32
    %c2_i32 = arith.constant 2 : i32
    %9 = arith.addi %c0_i32, %c2_i32 : i32
    %c1_i32 = arith.constant 1 : i32
    %10 = scf.for %arg9 = %c0_i32 to %9 step %c1_i32 iter_args(%arg10 = %7) -> (vector<16x128xf32>)  : i32 {
      %c2_i32_17 = arith.constant 2 : i32
      %19 = arith.muli %arg9, %c2_i32_17 : i32
      %c0_i32_18 = arith.constant 0 : i32
      %20 = arith.addi %19, %c0_i32_18 : i32
      %c1_i32_19 = arith.constant 1 : i32
      %21 = tpu.dynamic_rotate %arg10 by %c1_i32_19 dim 0 : vector<16x128xf32>, i32 -> vector<16x128xf32>
      %c1_i32_20 = arith.constant 1 : i32
      %22 = vector.broadcast %c1_i32_20 : i32 to vector<16x1xi32>
      %23 = arith.cmpi sge, %8, %22 : vector<16x1xi32>
      %cst_21 = arith.constant 0.000000e+00 : f32
      %24 = vector.shape_cast %23 : vector<16x1xi1> to vector<16x1xi1>
      %25 = vector.broadcast %24 : vector<16x1xi1> to vector<16x128xi1>
      %26 = vector.broadcast %cst_21 : f32 to vector<16x128xf32>
      %27 = arith.select %25, %21, %26 : vector<16x128xi1>, vector<16x128xf32>
      %28 = arith.truncf %27 : vector<16x128xf32> to vector<16x128xbf16>
      %29 = arith.truncf %arg10 : vector<16x128xf32> to vector<16x128xbf16>
      %30 = tpu.concatenate %28, %29 in 1 : vector<16x128xbf16>, vector<16x128xbf16> -> vector<16x256xbf16>
      %31 = arith.index_cast %20 : i32 to index
      %c0_22 = arith.constant 0 : index
      %c0_23 = arith.constant 0 : index
      %32 = vector.load %arg5[%31, %c0_22, %c0_23] : memref<4x256x128xbf16, #tpu.memory_space<vmem>>, vector<1x256x128xbf16>
      %33 = vector.shape_cast %32 : vector<1x256x128xbf16> to vector<256x128xbf16>
      %cst_24 = arith.constant dense<0.000000e+00> : vector<16x128xf32>
      %34 = tpu.matmul %30, %33, %cst_24 {dimension_numbers = #tpu.dot_dimension_numbers<[1], [0], [0], [1], [0, 0, 1, 1], [], []>} : vector<16x256xbf16>, vector<256x128xbf16>, vector<16x128xf32> -> vector<16x128xf32>
      %cst_25 = arith.constant 0.000000e+00 : f32
      %35 = vector.broadcast %cst_25 : f32 to vector<16x128xf32>
      %36 = arith.maximumf %34, %35 : vector<16x128xf32>
      %c2_i32_26 = arith.constant 2 : i32
      %37 = arith.muli %arg9, %c2_i32_26 : i32
      %c1_i32_27 = arith.constant 1 : i32
      %38 = arith.addi %37, %c1_i32_27 : i32
      %c2_i32_28 = arith.constant 2 : i32
      %39 = tpu.dynamic_rotate %36 by %c2_i32_28 dim 0 : vector<16x128xf32>, i32 -> vector<16x128xf32>
      %c2_i32_29 = arith.constant 2 : i32
      %40 = vector.broadcast %c2_i32_29 : i32 to vector<16x1xi32>
      %41 = arith.cmpi sge, %8, %40 : vector<16x1xi32>
      %cst_30 = arith.constant 0.000000e+00 : f32
      %42 = vector.shape_cast %41 : vector<16x1xi1> to vector<16x1xi1>
      %43 = vector.broadcast %42 : vector<16x1xi1> to vector<16x128xi1>
      %44 = vector.broadcast %cst_30 : f32 to vector<16x128xf32>
      %45 = arith.select %43, %39, %44 : vector<16x128xi1>, vector<16x128xf32>
      %46 = arith.truncf %45 : vector<16x128xf32> to vector<16x128xbf16>
      %47 = arith.truncf %36 : vector<16x128xf32> to vector<16x128xbf16>
      %48 = tpu.concatenate %46, %47 in 1 : vector<16x128xbf16>, vector<16x128xbf16> -> vector<16x256xbf16>
      %49 = arith.index_cast %38 : i32 to index
      %c0_31 = arith.constant 0 : index
      %c0_32 = arith.constant 0 : index
      %50 = vector.load %arg5[%49, %c0_31, %c0_32] : memref<4x256x128xbf16, #tpu.memory_space<vmem>>, vector<1x256x128xbf16>
      %51 = vector.shape_cast %50 : vector<1x256x128xbf16> to vector<256x128xbf16>
      %cst_33 = arith.constant dense<0.000000e+00> : vector<16x128xf32>
      %52 = tpu.matmul %48, %51, %cst_33 {dimension_numbers = #tpu.dot_dimension_numbers<[1], [0], [0], [1], [0, 0, 1, 1], [], []>} : vector<16x256xbf16>, vector<256x128xbf16>, vector<16x128xf32> -> vector<16x128xf32>
      %cst_34 = arith.constant 0.000000e+00 : f32
      %53 = vector.broadcast %cst_34 : f32 to vector<16x128xf32>
      %54 = arith.maximumf %52, %53 : vector<16x128xf32>
      %55 = arith.addf %54, %arg10 : vector<16x128xf32>
      scf.yield %55 : vector<16x128xf32>
    }
    %c2_i32_8 = arith.constant 2 : i32
    %11 = arith.truncf %10 : vector<16x128xf32> to vector<16x128xbf16>
    %c0_9 = arith.constant 0 : index
    %c0_10 = arith.constant 0 : index
    %12 = vector.load %arg6[%c0_9, %c0_10] : memref<128x128xbf16, #tpu.memory_space<vmem>>, vector<128x128xbf16>
    %cst_11 = arith.constant dense<0.000000e+00> : vector<16x128xf32>
    %13 = tpu.matmul %11, %12, %cst_11 {dimension_numbers = #tpu.dot_dimension_numbers<[1], [0], [0], [1], [0, 0, 1, 1], [], []>} : vector<16x128xbf16>, vector<128x128xbf16>, vector<16x128xf32> -> vector<16x128xf32>
    %c0_12 = arith.constant 0 : index
    %c0_13 = arith.constant 0 : index
    %14 = vector.load %arg7[%c0_12, %c0_13] : memref<1x128xf32, #tpu.memory_space<vmem>>, vector<1x128xf32>
    %15 = vector.broadcast %14 : vector<1x128xf32> to vector<16x128xf32>
    %16 = arith.addf %13, %15 : vector<16x128xf32>
    %17 = vector.shape_cast %16 : vector<16x128xf32> to vector<1x16x128xf32>
    %c0_14 = arith.constant 0 : index
    %c0_15 = arith.constant 0 : index
    %c0_16 = arith.constant 0 : index
    %18 = vector.load %arg8[%c0_14, %c0_15, %c0_16] : memref<1x16x128xf32, #tpu.memory_space<vmem>>, vector<1x16x128xf32>
    tpu.vector_store %arg8[%c0_14, %c0_15, %c0_16], %17 {strides = array<i32>} : memref<1x16x128xf32, #tpu.memory_space<vmem>>, vector<1x16x128xf32>,
    return
  }
  func.func @transform_0(%arg0: i32) -> (i32, i32, i32) {
    %c0_i32 = arith.constant 0 : i32
    %c0_i32_0 = arith.constant 0 : i32
    %c0_i32_1 = arith.constant 0 : i32
    return %arg0, %c0_i32, %c0_i32_0 : i32, i32, i32
  }
  func.func @transform_1(%arg0: i32) -> (i32, i32) {
    %c0_i32 = arith.constant 0 : i32
    %c0_i32_0 = arith.constant 0 : i32
    %c0_i32_1 = arith.constant 0 : i32
    return %c0_i32, %c0_i32_0 : i32, i32
  }
  func.func @transform_2(%arg0: i32) -> (i32, i32) {
    %c0_i32 = arith.constant 0 : i32
    %c0_i32_0 = arith.constant 0 : i32
    %c0_i32_1 = arith.constant 0 : i32
    return %c0_i32, %c0_i32_0 : i32, i32
  }
  func.func @transform_3(%arg0: i32) -> (i32, i32) {
    %c0_i32 = arith.constant 0 : i32
    %c0_i32_0 = arith.constant 0 : i32
    %c0_i32_1 = arith.constant 0 : i32
    return %c0_i32, %c0_i32_0 : i32, i32
  }
  func.func @transform_4(%arg0: i32) -> (i32, i32, i32) {
    %c0_i32 = arith.constant 0 : i32
    %c0_i32_0 = arith.constant 0 : i32
    %c0_i32_1 = arith.constant 0 : i32
    %c0_i32_2 = arith.constant 0 : i32
    return %c0_i32, %c0_i32_0, %c0_i32_1 : i32, i32, i32
  }
  func.func @transform_5(%arg0: i32) -> (i32, i32) {
    %c0_i32 = arith.constant 0 : i32
    %c0_i32_0 = arith.constant 0 : i32
    %c0_i32_1 = arith.constant 0 : i32
    return %c0_i32, %c0_i32_0 : i32, i32
  }
  func.func @transform_6(%arg0: i32) -> (i32, i32) {
    %c0_i32 = arith.constant 0 : i32
    %c0_i32_0 = arith.constant 0 : i32
    %c0_i32_1 = arith.constant 0 : i32
    return %c0_i32, %c0_i32_0 : i32, i32
  }
  func.func @transform_7(%arg0: i32) -> (i32, i32, i32) {
    %c0_i32 = arith.constant 0 : i32
    %c0_i32_0 = arith.constant 0 : i32
    %c0_i32_1 = arith.constant 0 : i32
    return %arg0, %c0_i32, %c0_i32_0 : i32, i32, i32
  }
}

</mosaic_0001>

<bundles_post_ra>
// kernel: tpu_custom_call.1
= control target key start
LH: loop header
LB: loop body
LE: loop exit
PB: predicated region body
PF: predicated region fallthrough
CT: control target
= control target key end

     0   :  { %12 = vsyncpa [#allocation3], 0  ;;  %s1727_s0 = inlined_call_operand.vmem [shape: f32[2,16,8], index: 0, kind: input, shape index: {}]   ;;  %s1728_s1 = inlined_call_operand.vmem [shape: s32[16,1], index: 1, kind: input, shape index: {}]   ;;  %s1729_s2 = inlined_call_operand.vmem [shape: bf16[8,128], index: 2, kind: input, shape index: {}]   ;;  %s1730_s3 = inlined_call_operand.vmem [shape: f32[1,128], index: 3, kind: input, shape index: {}]   ;;  %s1731_s4 = inlined_call_operand.hbm [shape: bf16[4,256,128], index: 4, kind: input, shape index: {}]   ;;  %s1732_s5 = inlined_call_operand.vmem [shape: bf16[128,128], index: 5, kind: input, shape index: {}]   ;;  %s1733_s6 = inlined_call_operand.vmem [shape: f32[1,128], index: 6, kind: input, shape index: {}]   ;;  %s1734_s7 = inlined_call_operand.hbm [shape: f32[2,16,128], index: 7, kind: output, shape index: {}]  }
   0x1   :  { %13 = vsyncpa [#allocation4], 0 }
   0x2   :  { %15 = vsyncpa [#allocation4 + $0x1], 0  ;;  %s1457_s24 = smov 0   ;;  %s1459_s25 = smov 0  }
   0x3   :  { %s1461_s26 = smov 0   ;;  %s1463_s27 = smov 0  }
   0x4 LB: > { %s1478_s28 = sadd.s32 4294967295, %s1394_s27   ;;  %s979_s29 = sadd.s32 4294967294, %s1394_s27   ;;  %s1394_s27 = sphi %s1463_s27, %s1752_s27   ;;  %s1390_s26 = sphi %s1461_s26, %s1751_s26   ;;  %s1386_s25 = sphi %s1459_s25, %s1750_s25   ;;  %s1382_s24 = sphi %s1457_s24, %s1749_s24  }
   0x5   : > { %s1482_s30 = sadd.s32 1, %s1394_s27   ;;  %s180_s8 = sadd.s32 1, %s1390_s26 }
   0x6   : > { %s177_s9 = ssub.s32 %s1394_s27, %s1482_s30  ;;  %p190_p0 = scmp.ne.s32.totalorder %s1390_s26, %s1386_s25 }
   0x7   : > { %p178_p1 = scmp.eq.s32.totalorder %s177_s9, 0  ;;  %p191_p2 = scmp.eq.s32.totalorder %s1478_s28, 1 }
   0x8   : > { %p196_p3 = scmp.ne.s32.totalorder %s1386_s25, %s1382_s24  ;;  %p197_p4 = scmp.eq.s32.totalorder %s979_s29, 1 }
   0x9   : > { %s1493_s10 = scalar_select %p178_p1, %s1390_s26, %s180_s8  }
   0xa   : > { %p1495_p5 = por %p191_p2, %p190_p0  ;;  %p1499_p6 = por %p197_p4, %p196_p3 }
   0xb   : > { %p980_p7 = scmp.ge.s32.totalorder %s1394_s27, 1  ;;  %p204_p8 = scmp.lt.s32.totalorder %s1394_s27, 3 }
   0xc   : > { %s1738_s11 = scalar_select %p1495_p5, 1, 0 }
   0xd   : > { %s1739_s12 = scalar_select %p1499_p6, 1, 0 }
   0xe   : > { %p1735_p9 = scmp.eq.s32.totalorder %s1478_s28, 0  ;;  %p1506_p10 = pnand %p980_p7, %p204_p8 }
   0xf   : > { %s1408_s14 = smov [#allocation2]   ;;  %s1288_s19 = scalar_lea.hbm %s1731_s4, 8192 }
  0x10   : > { %s1740_s13 = scalar_select %p1506_p10, 1, 0 }
  0x11   : > { %s225_s15 = sshll.u32 %s1408_s14, 4  ;;  %p1171_p11 = pneg %p1506_p10  ;;  %s226_s15 = int_to_ptr.vmem [resolvable:$true] %s225_s15 }
  0x12   : > { %p1289_p13 = scmp.ne.s32.totalorder %s1731_s4, %s1288_s19  ;;  %p1295_p3 = scmp.lt.u32.totalorder %s1288_s19, %s1731_s4 }
  0x13   : > { %p1514_p12 = pnand %p1735_p9, %p1171_p11 }
  0x15   : > { %p1290_p0 = pneg %p1514_p12 }
  0x17   : > { %p1291_p1 = pnand %p1290_p0, %p1289_p13 }
  0x19   : > { %p1292_p2 = pneg %p1291_p1 }
  0x1b   : > { %p1297_p4 = pnand %p1295_p3, %p1292_p2 }
  0x1d   : > { %1300 = shalt.err (!%p1297_p4)
}
  0x1e   : > { %s1301_s29 = scalar_lea.vmem %s226_s15, 8192  ;;  %p1309_p9 = scmp.lt.s32.totalorder %s226_s15, %s226_s15 }
  0x1f   : > { %p1302_p7 = scmp.ne.s32.totalorder %s226_s15, %s1301_s29  ;;  %p1310_p6 = scmp.lt.s32.totalorder %s1301_s29, %s1301_s29 }
  0x21   : > { %p1304_p8 = pnand %p1302_p7, %p1290_p0  ;;  %p1311_p5 = por %p1310_p6, %p1309_p9 }
  0x23   : > { %p1305_p11 = pneg %p1304_p8 }
  0x25   : > { %p1312_p10 = pnand %p1311_p5, %p1305_p11 }
  0x27   : > { %1315 = shalt.err (!%p1312_p10)
}
  0x28   : > { %s1409_s8 = smov 64   ;;  %s1410_s9 = smov 4  }
  0x29   : > { %1174 = dma.hbm_to_vmem [thread:$0]  (!%p1514_p12), %s1731_s4, 8192, %s226_s15, [#allocation3], %s1409_s8, %s1409_s8, %s1410_s9  }
  0x2a   : > { %p1742_p13 = scmp.ne.s32.totalorder %s1740_s13, 0 }
  0x2b   : > { %p1743_p1 = scmp.eq.s32.totalorder (!%p1742_p13), %s1478_s28, 0 }
  0x2c   : > { %255 = sbr.rel (%p1742_p13) target bundleno = 1115 (0x45b), region = 48 }
  0x33   : > { %1373 = dma.done.wait (%p1743_p1), [#allocation3], 8192   ;;  %p1744_p0 = pmov %p1743_p1 }
  0x34   : > { %s284_s18 = sand.u32 1, %s1386_s25   ;;  %v1411_v0 = vmov 0.0   ;;  %vm1412_vm0 = vmmov 0   ;;  %p287_p5 = scmp.lt.s32.totalorder %s1478_s28, 1  ;;  %vm308_vm1 = vcmask 1043456   ;;  %v1554_v1 = vld [vmem:[%s1728_s1] sm:$0xff] }
  0x35   : > { %1375 = vsyncadd (%p1744_p0), [#allocation3], 4294959104  ;;  %s985_s16 = sshll.u32 %s284_s18, 4  ;;  %1139 = vmatprep.subr.bf16.mxu0 %v1411_v0  ;;  %1141 = vmatprep.mubr.msk.bf16.mxu0 %vm1412_vm0, %v1411_v0  ;;  %v1559_v2 = vld [vmem:[%s1728_s1 + $0x8] sm:$0xff]  ;;  %v296_v3 = vld [vmem:[%s1729_s2] sm:$0xf] }
  0x36   : > { %s288_s13 = scalar_select %p287_p5, %s1478_s28, 1  ;;  %v310_v4 = vsel %vm308_vm1, %v296_v3, 0  ;;  %vm304_vm2 = vcmask 64512   ;;  %v988_v8 = vld [vmem:[%s1730_s3] ss:$0 sm:$0xff] }
  0x37   : > { %1140 = vmatpush3.bf16.msra.mxu0 %v310_v4  ;;  %s1573_s19 = smov 0  }
  0x38   : > { %s1079_s15 = sshll.u32 %s288_s13, 4 }
  0x39   : > { %s291_s21 = scalar_lea.vmem %s1727_s0, %s1079_s15  ;;  %s1567_s15 = scalar_lea.vmem [#allocation5], %s985_s16 }
  0x3a   : > { %v293_v5 = vld [vmem:[%s291_s21] sm:$0xff]  ;;  %v294_v6 = vld [vmem:[%s291_s21 + $0x8] sm:$0xff] }
  0x3b   : > { %v295_v7 = vpack.c.bf16 %v294_v6, %v293_v5 }
  0x3d   : > { %1142 = vmatmul.mubr.msk.bf16.vlgmr.msra.gmra.mrb[0].mxu0 %vm304_vm2, %v295_v7 }
 0x110   : > { %v346_v9 = vpop.f32.mrb[0].mxu0 }
 0x111   : > { %v347_v10 = vadd.f32 %v988_v8, %v346_v9   ;;  %v1143_v11 = vpop.f32.mrb[1].mxu0 }
 0x112   : > { %v349_v12 = vpop.f32.mrb[2].mxu0 }
 0x113   : > { %v350_v13 = vadd.f32 %v988_v8, %v349_v12   ;;  %v1144_v14 = vpop.f32.mrb[3].mxu0 }
 0x114 LB: >> { %vm371_vm3 = vcmp.ge.s32.totalorder %v1554_v1, 1  ;;  %vm372_vm4 = vcmp.ge.s32.totalorder %v1559_v2, 1  ;;  %v1413_v15 = vmov 0   ;;  %s1081_s16 = sshll.u32 %s1406_s19, 8  ;;  %v386_v20 = vpack.c.bf16 %v1398_v13, %v1402_v10  ;;  %s360_s19 = sadd.s32 1, %s1406_s19   ;;  %s1406_s19 = sphi %s1573_s19, %s360_s19   ;;  %v1402_v10 = vphi %v347_v10, %v1746_v10   ;;  %v1398_v13 = vphi %v350_v13, %v1745_v13  }
 0x115   : >> { %1246 = vset.pattern.permute.xlu0 %v1413_v15  ;;  %v373_v16 = vsel %vm371_vm3, 1, %v1413_v15  ;;  %1247 = vset.pattern.permute.xlu1 %v1413_v15  ;;  %v374_v17 = vsel %vm372_vm4, 1, %v1413_v15  ;;  %s1587_s20 = scalar_lea.vmem [#allocation2], %s1081_s16  ;;  %vm567_vm5 = vcmp.ge.s32.totalorder %v1554_v1, 2  ;;  %vm568_vm6 = vcmp.ge.s32.totalorder %v1559_v2, 2  ;;  %p357_p6 = scmp.ge.s32.totalorder %s360_s19, 2  }
 0x116   : >> { %376 = vperm.xlu0 %1246, %v373_v16   ;;  %v1248_v18 = vld [vmem:[%s1587_s20 + $0x40] sm:$0xff]   ;;  %v1250_v21 = vld [vmem:[%s1587_s20 + $0x48] sm:$0xff]   ;;  %550 = vmatprep.mubr.bf16.mxu0 %v386_v20  ;;  %v1252_v23 = vld [vmem:[%s1587_s20 + $0x50] sm:$0xff]   ;;  %v569_v24 = vsel %vm567_vm5, 1, %v1413_v15  ;;  %v570_v26 = vsel %vm568_vm6, 1, %v1413_v15  ;;  %v366_v47 = vlaneseq  ;;  %v364_v49 = vrot.slane %v1402_v10, 7 }
 0x117   : >> { %v1249_v19 = vld [vmem:[%s1587_s20] sm:$0xff]   ;;  %1086 = vmatprep.subr.bf16.mxu0 %v1248_v18  ;;  %v1251_v22 = vld [vmem:[%s1587_s20 + $0x8] sm:$0xff]   ;;  %572 = vperm.xlu1 %1247, %v569_v24   ;;  %v1253_v25 = vld [vmem:[%s1587_s20 + $0x10] sm:$0xff]   ;;  %v365_v50 = vrot.slane %v1398_v13, 7  ;;  %s1083_s14 = sshll.u32 (%p357_p6), %s1478_s28, 8  ;;  %s888_s17 = sshll.u32 (%p357_p6), %s1567_s15, 4  ;;  %s1680_s17 = int_to_ptr.vmem [resolvable:$true] %s888_s17 }
 0x118   : >> { %1087 = vmatpush3.bf16.msra.mxu0 %v1249_v19  ;;  %v1254_v27 = vld [vmem:[%s1587_s20 + $0x58] sm:$0xff]   ;;  %v1256_v29 = vld [vmem:[%s1587_s20 + $0x60] sm:$0xff]   ;;  %v1258_v31 = vld [vmem:[%s1587_s20 + $0x68] sm:$0xff]   ;;  %v367_v48 = vshrl.u32 %v366_v47, 7  ;;  %s1678_s16 = scalar_lea.hbm (%p357_p6), %s1734_s7, %s1083_s14  ;;  %s1686_s28 = scalar_lea.sflag (%p357_p6), [#allocation4], %s284_s18 }
 0x119   : >> { %1088 = vmatprep.subr.bf16.mxu0 %v1250_v21  ;;  %v1255_v28 = vld [vmem:[%s1587_s20 + $0x18] sm:$0xff]   ;;  %v1257_v30 = vld [vmem:[%s1587_s20 + $0x20] sm:$0xff]   ;;  %v1259_v33 = vld [vmem:[%s1587_s20 + $0x28] sm:$0xff]   ;;  %p1747_p10 = scmp.ne.s32.totalorder (%p357_p6), %s1738_s11, 0  ;;  %s1414_s21 = smov (%p357_p6), [#allocation5]  }
 0x11a   : >> { %379 = vperm.xlu0 %1246, %v374_v17   ;;  %v1264_v32 = vld [vmem:[%s1587_s20 + $0xc0] sm:$0xff]   ;;  %v1260_v35 = vld [vmem:[%s1587_s20 + $0x70] sm:$0xff]   ;;  %v1266_v36 = vld [vmem:[%s1587_s20 + $0xc8] sm:$0xff]   ;;  %vm368_vm7 = vcmp.lt.s32.totalorder %v367_v48, 1  ;;  %vm564_vm11 = vcmp.lt.s32.totalorder %v367_v48, 2  ;;  %s1320_s22 = sshll.u32 (%p357_p6), %s1414_s21, 4  ;;  %s1321_s22 = int_to_ptr.vmem [resolvable:$false] %s1320_s22 }
 0x11b   : >> { %575 = vperm.xlu1 %1247, %v570_v26   ;;  %v1265_v34 = vld [vmem:[%s1587_s20 + $0x80] sm:$0xff]   ;;  %1108 = vmatprep.subr.bf16.mxu1 %v1264_v32  ;;  %v1267_v37 = vld [vmem:[%s1587_s20 + $0x88] sm:$0xff]   ;;  %v1268_v38 = vld [vmem:[%s1587_s20 + $0xd0] sm:$0xff]   ;;  %v369_v52 = vsel %vm368_vm7, %v364_v49, %v365_v50  ;;  %v370_v53 = vsel %vm368_vm7, %v365_v50, %v364_v49  ;;  %s1322_s23 = scalar_lea.vmem (%p357_p6), %s1321_s22, 512  ;;  %p1323_p3 = scmp.lt.s32.totalorder (%p357_p6), %s1680_s17, %s1321_s22 }
 0x11c   : >> { %1089 = vmatpush3.bf16.msra.mxu0 %v1251_v22  ;;  %1109 = vmatpush3.bf16.msra.mxu1 %v1265_v34  ;;  %v1261_v39 = vld [vmem:[%s1587_s20 + $0x30] sm:$0xff]   ;;  %v1262_v40 = vld [vmem:[%s1587_s20 + $0x78] sm:$0xff]   ;;  %v1272_v45 = vld [vmem:[%s1587_s20 + $0xe0] sm:$0xff]   ;;  %v1010_v54 = vpack.c.bf16 %v369_v52, %v370_v53 }
 0x11d   : >> { %1090 = vmatprep.subr.bf16.mxu0 %v1252_v23  ;;  %1110 = vmatprep.subr.bf16.mxu1 %v1266_v36  ;;  %v1269_v41 = vld [vmem:[%s1587_s20 + $0x90] sm:$0xff]   ;;  %v1270_v42 = vld [vmem:[%s1587_s20 + $0xd8] sm:$0xff]   ;;  %v1273_v46 = vld [vmem:[%s1587_s20 + $0xa0] sm:$0xff]  }
 0x11e   : >> { %v1263_v43 = vld [vmem:[%s1587_s20 + $0x38] sm:$0xff]   ;;  %v1274_v56 = vld [vmem:[%s1587_s20 + $0xe8] sm:$0xff]   ;;  %v1276_v58 = vld [vmem:[%s1587_s20 + $0xf0] sm:$0xff]  }
 0x11f   : >> { %v1271_v44 = vld [vmem:[%s1587_s20 + $0x98] sm:$0xff]   ;;  %v1275_v57 = vld [vmem:[%s1587_s20 + $0xa8] sm:$0xff]   ;;  %v1277_v59 = vld [vmem:[%s1587_s20 + $0xb0] sm:$0xff]  }
 0x120   : >> { %1091 = vmatpush3.bf16.msra.mxu0 %v1253_v25  ;;  %1111 = vmatpush3.bf16.msra.mxu1 %v1267_v37  ;;  %v1278_v60 = vld [vmem:[%s1587_s20 + $0xf8] sm:$0xff]   ;;  %v1282_v1 = vld [vmem:[%s1732_s5 + $0x10] sm:$0xff] (%p357_p6)   ;;  %v1065_v34 = vld [vmem:[%s1733_s6] ss:$0 sm:$0xff] (%p357_p6) }
 0x121   : >> { %1092 = vmatprep.subr.bf16.mxu0 %v1254_v27  ;;  %1112 = vmatprep.subr.bf16.mxu1 %v1268_v38  ;;  %v1279_v61 = vld [vmem:[%s1587_s20 + $0xb8] sm:$0xff]   ;;  %s1316_s20 = scalar_lea.vmem (%p357_p6), %s1680_s17, 256 }
 0x122   : > { %v1283_v2 = vld [vmem:[%s1732_s5 + $0x18] sm:$0xff] (%p357_p6)   ;;  %p1317_p9 = scmp.ne.s32.totalorder (%p357_p6), %s1680_s17, %s1316_s20  ;;  %p1324_p4 = scmp.lt.s32.totalorder (%p357_p6), %s1322_s23, %s1316_s20 }
 0x123   : > { %v1287_v32 = vld [vmem:[%s1732_s5 + $0x38] sm:$0xff] (%p357_p6)  }
 0x124   : >> { %1093 = vmatpush3.bf16.msra.mxu0 %v1255_v28  ;;  %1113 = vmatpush3.bf16.msra.mxu1 %v1269_v41  ;;  %p1318_p12 = pnand (%p357_p6), %p1317_p9, %p1747_p10  ;;  %p1325_p7 = por (%p357_p6), %p1324_p4, %p1323_p3 }
 0x125   : >> { %1094 = vmatprep.subr.bf16.mxu0 %v1256_v29  ;;  %1114 = vmatprep.subr.bf16.mxu1 %v1270_v42  ;;  %v1280_v29 = vld [vmem:[%s1732_s5] sm:$0xff] (%p357_p6)  }
 0x126   : > { %p1319_p2 = pneg (%p357_p6), %p1318_p12 }
 0x128   : >> { %1095 = vmatpush3.bf16.msra.mxu0 %v1257_v30  ;;  %1115 = vmatpush3.bf16.msra.mxu1 %v1271_v44  ;;  %v1285_v30 = vld [vmem:[%s1732_s5 + $0x28] sm:$0xff] (%p357_p6)   ;;  %p1326_p8 = pnand (%p357_p6), %p1325_p7, %p1319_p2 }
 0x129   : >> { %1096 = vmatprep.subr.bf16.mxu0 %v1258_v31  ;;  %1116 = vmatprep.subr.bf16.mxu1 %v1272_v45  ;;  %v1286_v31 = vld [vmem:[%s1732_s5 + $0x30] sm:$0xff] (%p357_p6)  }
 0x12c   : >> { %1097 = vmatpush3.bf16.msra.mxu0 %v1259_v33  ;;  %1117 = vmatpush3.bf16.msra.mxu1 %v1273_v46 }
 0x12d   : >> { %1098 = vmatprep.subr.bf16.mxu0 %v1260_v35  ;;  %1118 = vmatprep.subr.bf16.mxu1 %v1274_v56 }
 0x130   : >> { %1099 = vmatpush3.bf16.msra.mxu0 %v1261_v39  ;;  %1119 = vmatpush3.bf16.msra.mxu1 %v1275_v57 }
 0x131   : >> { %1100 = vmatprep.subr.bf16.mxu0 %v1262_v40  ;;  %1120 = vmatprep.subr.bf16.mxu1 %v1276_v58 }
 0x134   : >> { %1101 = vmatpush3.bf16.msra.mxu0 %v1263_v43  ;;  %1121 = vmatpush3.bf16.msra.mxu1 %v1277_v59 }
 0x135   : >> { %1122 = vmatprep.subr.bf16.mxu1 %v1278_v60  ;;  %1145 = vmatprep.subr.bf16.mxu0 (%p357_p6), %v1411_v0 }
 0x138   : >> { %1123 = vmatpush3.bf16.msra.mxu1 %v1279_v61 }
 0x195   : >> { %v377_v51 = vpop.permute.xlu0 %376 }
 0x196   : >> { %vm381_vm8 = vcmp.eq.s32.totalorder %v377_v51, 1  ;;  %v573_v63 = vpop.permute.xlu1 %572 }
 0x197   : >> { %vm577_vm12 = vcmp.eq.s32.totalorder %v573_v63, 1 }
 0x199   : >> { %v380_v55 = vpop.permute.xlu0 %379 }
 0x19a   : >> { %vm382_vm9 = vcmp.eq.s32.totalorder %v380_v55, 1  ;;  %v576_v11 = vpop.permute.xlu1 %575 }
 0x19b   : >> { %vm1009_vm10 = vmpackc.low %vm382_vm9, %vm381_vm8  ;;  %vm578_vm13 = vcmp.eq.s32.totalorder %v576_v11, 1 }
 0x19c   : >> { %1011 = vmatmul.mubr.msk.bf16.vlgmr.msra.gmra.mrb[0].mxu0 %vm1009_vm10, %v1010_v54  ;;  %vm1062_vm14 = vmpackc.low %vm578_vm13, %vm577_vm12 }
 0x19d   : > { %1161 = vmatprep.mubr.msk.bf16.mxu0 (%p357_p6), %vm1412_vm0, %v1411_v0  ;;  %1146 = vmatpush3.bf16.msra.mxu0 (%p357_p6), %v1280_v29 }
 0x19e   : > { %1147 = vmatprep.subr.bf16.mxu0 (%p357_p6), %v1411_v0 }
 0x26f   : >> { %v1102_v62 = vpop.f32.mrb[0].mxu0 }
 0x270   : >> { %v1103_v3 = vpop.f32.mrb[1].mxu0 }
 0x271   : >> { %v1104_v4 = vadd.f32 %v1103_v3, %v1102_v62  ;;  %v1105_v5 = vpop.f32.mrb[2].mxu0 }
 0x272   : >> { %v1106_v6 = vpop.f32.mrb[3].mxu0 }
 0x273   : >> { %v559_v7 = vmax.f32 %v1104_v4, 0.0  ;;  %v1107_v8 = vadd.f32 %v1106_v6, %v1105_v5 }
 0x275   : >> { %v560_v9 = vmax.f32 %v1107_v8, 0.0  ;;  %v562_v12 = vrot.slane %v559_v7, 6 }
 0x277   : >> { %v563_v14 = vrot.slane %v560_v9, 6  ;;  %v582_v15 = vpack.c.bf16 %v560_v9, %v559_v7 }
 0x279   : >> { %v565_v16 = vsel %vm564_vm11, %v562_v12, %v563_v14  ;;  %v566_v17 = vsel %vm564_vm11, %v563_v14, %v562_v12  ;;  %746 = vmatprep.mubr.bf16.mxu1 %v582_v15 }
 0x27a   : >> { %v1063_v18 = vpack.c.bf16 %v565_v16, %v566_v17 }
 0x27c   : >> { %1064 = vmatmul.mubr.msk.bf16.vlgmr.msra.gmra.mrb[0].mxu1 %vm1062_vm14, %v1063_v18 }
 0x34f   : >> { %v1124_v19 = vpop.f32.mrb[0].mxu1 }
 0x350   : >> { %v1125_v20 = vpop.f32.mrb[1].mxu1 }
 0x351   : >> { %v1126_v21 = vadd.f32 %v1125_v20, %v1124_v19  ;;  %v1127_v22 = vpop.f32.mrb[2].mxu1 }
 0x352   : >> { %v1128_v23 = vpop.f32.mrb[3].mxu1 }
 0x353   : >> { %v755_v24 = vmax.f32 %v1126_v21, 0.0  ;;  %v1129_v25 = vadd.f32 %v1128_v23, %v1127_v22  ;;  %359 = sbr.rel (!%p357_p6) target bundleno = 276 (0x114), region = 97 }
 0x355   : >> { %v757_v26 = vadd.f32 %v1402_v10, %v755_v24   ;;  %v756_v27 = vmax.f32 %v1129_v25, 0.0 }
 0x357   : >> { %v758_v28 = vadd.f32 %v1398_v13, %v756_v27   ;;  %v1746_v10 = vmov %v757_v26 }
 0x358   : > { %v1281_v10 = vld [vmem:[%s1732_s5 + $0x8] sm:$0xff] (%p357_p6)  }
 0x359   : >> { %v1745_v13 = vmov %v758_v28  ;;  %1148 = vmatpush3.bf16.msra.mxu0 (%p357_p6), %v1281_v10  ;;  %v759_v33 = vpack.c.bf16 (%p357_p6), %v758_v28, %v757_v26 }
 0x35a   : > { %1149 = vmatprep.subr.bf16.mxu0 %v1411_v0  ;;  %v1284_v13 = vld [vmem:[%s1732_s5 + $0x20] sm:$0xff]  }
 0x35d   : > { %1150 = vmatpush3.bf16.msra.mxu0 %v1282_v1 }
 0x35e   : > { %1151 = vmatprep.subr.bf16.mxu0 %v1411_v0 }
 0x361   : > { %1152 = vmatpush3.bf16.msra.mxu0 %v1283_v2 }
 0x362   : > { %1153 = vmatprep.subr.bf16.mxu0 %v1411_v0 }
 0x365   : > { %1154 = vmatpush3.bf16.msra.mxu0 %v1284_v13 }
 0x366   : > { %1155 = vmatprep.subr.bf16.mxu0 %v1411_v0 }
 0x369   : > { %1156 = vmatpush3.bf16.msra.mxu0 %v1285_v30 }
 0x36a   : > { %1157 = vmatprep.subr.bf16.mxu0 %v1411_v0 }
 0x36d   : > { %1158 = vmatpush3.bf16.msra.mxu0 %v1286_v31 }
 0x36e   : > { %1159 = vmatprep.subr.bf16.mxu0 %v1411_v0 }
 0x371   : > { %1160 = vmatpush3.bf16.msra.mxu0 %v1287_v32 }
 0x374   : > { %1162 = vmatmul.mubr.bf16.vlgmr.msra.gmra.mrb[0].mxu0 %v759_v33 }
 0x447   : > { %v865_v35 = vpop.f32.mrb[0].mxu0 }
 0x448   : > { %v866_v36 = vadd.f32 %v1065_v34, %v865_v35  ;;  %v1163_v37 = vpop.f32.mrb[1].mxu0 }
 0x449   : > { %v868_v38 = vpop.f32.mrb[2].mxu0 }
 0x44a   : > { %872 = vst [vmem:[%s1567_s15] sm:$0xff] %v866_v36  ;;  %v869_v0 = vadd.f32 %v1065_v34, %v868_v38  ;;  %v1164_v39 = vpop.f32.mrb[3].mxu0 }
 0x44c   : > { %873 = vst [vmem:[%s1567_s15 + $0x8] sm:$0xff] %v869_v0 }
 0x44d   : > { %1329 = shalt.err (!%p1326_p8)
}
 0x44e   : > { %s1330_s18 = scalar_lea.hbm %s1678_s16, 256  ;;  %s1334_s8 = scalar_lea.hbm %s1734_s7, 512 }
 0x44f   : > { %p1331_p11 = scmp.ne.s32.totalorder %s1678_s16, %s1330_s18  ;;  %p1335_p0 = scmp.lt.u32.totalorder %s1678_s16, %s1734_s7 }
 0x450   : > { %p1336_p5 = scmp.lt.u32.totalorder %s1334_s8, %s1330_s18  ;;  %p1338_p9 = scmp.lt.u32.totalorder %s1330_s18, %s1678_s16 }
 0x451   : > { %p1332_p13 = pnand %p1331_p11, %p1747_p10 }
 0x452   : > { %p1337_p6 = por %p1336_p5, %p1335_p0 }
 0x453   : > { %p1333_p1 = pneg %p1332_p13 }
 0x454   : > { %p1339_p12 = por %p1338_p9, %p1337_p6 }
 0x456   : > { %p1340_p2 = pnand %p1339_p12, %p1333_p1 }
 0x458   : > { %1343 = shalt.err (!%p1340_p2)
}
 0x459   : > { %s1415_s13 = smov 128   ;;  %s1416_s19 = smov 8  }
 0x45a   : > { %1169 = dma.vmem_to_hbm [thread:$0]  (%p1747_p10), %s1680_s17, 256, %s1678_s16, %s1686_s28, %s1415_s13, %s1415_s13, %s1416_s19  }
 0x45b PF: > { %p1181_p3 = scmp.ge.s32.totalorder %s1394_s27, 2  ;;  %s903_s20 = sand.u32 1, %s1382_s24  }
 0x45c   : > { %p1748_p4 = scmp.ne.s32.totalorder %s1739_s12, 0  ;;  %s904_s21 = scalar_lea.sflag [#allocation4], %s903_s20 }
 0x45e   : > { %p1176_p7 = pnand %p1181_p3, %p1748_p4 }
 0x460   : > { %1377 = dma.done.wait (!%p1176_p7), %s904_s21, 256  }
 0x461   : > { %1379 = vsyncadd (!%p1176_p7), %s904_s21, 4294967040  ;;  %p18_p8 = scmp.ge.s32.totalorder %s1482_s30, 4   ;;  %s1749_s24 = smov %s1386_s25 }
 0x462   : > { %s1750_s25 = smov %s1390_s26  ;;  %s1751_s26 = smov %s1493_s10 }
 0x463   : > { %s1752_s27 = smov %s1482_s30  ;;  %20 = sbr.rel (!%p18_p8) target bundleno = 4 (0x4), region = 108 }
 0x46a   :  { %909 = vsyncpa [#allocation3], 1 }
 0x46b   :  { %911 = vsyncpa [#allocation3 + $0x1], 1 }
 0x46c   :  { %912 = vsyncpa [#allocation4], 1 }
 0x46d   :  { %914 = vsyncpa [#allocation4 + $0x1], 1 }

</bundles_post_ra>
